<compile_context>
chip_gen: v5e
topology: v5e:2x2
jax: 0.10.0
libtpu: 0.0.40
codegen_flags: <defaults>
</compile_context>

<pallas_src>
import functools

import jax
import jax.numpy as jnp
from jax import lax
from jax.experimental import pallas as pl
from jax.experimental.pallas import tpu as pltpu


def _round_up(x, m):
    return ((x + m - 1) // m) * m


def _pick_tile(n, max_tile=512):
    """Largest divisor of n that is <= max_tile and sublane friendly (or n itself)."""
    for t in range(min(n, max_tile), 0, -1):
        if n % t == 0 and (t % 8 == 0 or t == n):
            return t
    return n


# --------------------- Encoder kernel: conv(3x3)+ReLU+mean-pool+fc, fused ---------------------

def _encoder_kernel(p_ref, wc_ref, bc_ref, fw_ref, fb_ref, o_ref, acc_ref, *, inv_hw):
    j = pl.program_id(1)                              # HW-tile (reduction) axis

    @pl.when(j == 0)
    def _():
        acc_ref[...] = jnp.zeros_like(acc_ref)

    x = p_ref[0]                                      # (t_hw, 9*Cin)  bf16
    conv = jnp.dot(x, wc_ref[...], preferred_element_type=jnp.float32)   # MXU, f32 acc
    conv = jnp.maximum(conv + bc_ref[...], 0.0)       # bias + ReLU in f32 (v5e-safe epilogue)
    acc_ref[...] += jnp.sum(conv, axis=0, keepdims=True)                 # running spatial sum

    @pl.when(j == pl.num_programs(1) - 1)
    def _():
        pooled = acc_ref[...] * inv_hw                                   # (1, Cout) mean pool
        feats = jnp.dot(pooled, fw_ref[...],
                        preferred_element_type=jnp.float32) + fb_ref[...]
        o_ref[0] = feats.astype(o_ref.dtype)


def encoder(params, images):
    """images: (B, Cin, H, W) NCHW float32 -> features (B, Hdim)."""
    B, Cin, H, W = images.shape
    Cout = params["conv_w"].shape[0]
    Hdim = params["fc_w"].shape[1]
    HW = H * W
    Kdim = 9 * Cin

    # im2col built directly channels-last: (B, H, W, ky*kx*Cin) -- no big transpose.
    x_nhwc = jnp.transpose(images, (0, 2, 3, 1))
    xp = jnp.pad(x_nhwc, ((0, 0), (1, 1), (1, 1), (0, 0)))
    cols = [xp[:, ky:ky + H, kx:kx + W, :] for ky in range(3) for kx in range(3)]
    patches = jnp.concatenate(cols, axis=-1).reshape(B, HW, Kdim)        # (B, HW, 9*Cin)
    w_conv = jnp.transpose(params["conv_w"], (2, 3, 1, 0)).reshape(Kdim, Cout)

    t_hw = _pick_tile(HW, 512)
    n_hw = HW // t_hw

    feats = pl.pallas_call(
        functools.partial(_encoder_kernel, inv_hw=1.0 / HW),
        out_shape=jax.ShapeDtypeStruct((B, 1, Hdim), jnp.float32),
        grid=(B, n_hw),
        in_specs=[
            pl.BlockSpec((1, t_hw, Kdim), lambda b, j: (b, j, 0)),
            pl.BlockSpec((Kdim, Cout), lambda b, j: (0, 0)),
            pl.BlockSpec((1, Cout), lambda b, j: (0, 0)),
            pl.BlockSpec((Cout, Hdim), lambda b, j: (0, 0)),
            pl.BlockSpec((1, Hdim), lambda b, j: (0, 0)),
        ],
        out_specs=pl.BlockSpec((1, 1, Hdim), lambda b, j: (b, 0, 0)),
        scratch_shapes=[pltpu.VMEM((1, Cout), jnp.float32)],
        compiler_params=pltpu.CompilerParams(
            dimension_semantics=("parallel", "arbitrary")),
    )(patches.astype(jnp.bfloat16),                 # bf16 MXU inputs (v6e/v7x win)
      w_conv.astype(jnp.bfloat16),
      params["conv_b"].reshape(1, Cout).astype(jnp.float32),
      params["fc_w"].astype(jnp.float32),
      params["fc_b"].reshape(1, Hdim).astype(jnp.float32))
    return feats.reshape(B, Hdim)


# --------------------- Decoder kernel: fused (x@Wx hoist) + RNN loop + output proj ------------

def _decoder_kernel(emb_ref, h0_ref, wx_ref, wh_ref, b_ref, ow_ref, ob_ref,
                    o_ref, xw_ref):
    T, Bp, E = emb_ref.shape
    Hp = wh_ref.shape[0]
    Vp = ow_ref.shape[1]

    # Hoisted input projection: one batched MXU matmul over all timesteps.
    emb2 = emb_ref[...].reshape(T * Bp, E)
    xw = jnp.dot(emb2, wx_ref[...], preferred_element_type=jnp.float32) + b_ref[...]
    xw_ref[...] = xw.reshape(T, Bp, Hp)

    # Serial recurrence: only h @ Wh is on the critical path. Hidden states are written
    # back into the same scratch (overwriting the no-longer-needed xw[t]).
    def step(t, h):
        h_new = jnp.tanh(xw_ref[t] +
                         jnp.dot(h, wh_ref[...], preferred_element_type=jnp.float32))
        xw_ref[t] = h_new
        return h_new

    lax.fori_loop(0, T, step, h0_ref[...], unroll=True)

    # Batched output projection over all timesteps (no HBM round trip of hidden states).
    h_all = xw_ref[...].reshape(T * Bp, Hp)
    logits = jnp.dot(h_all, ow_ref[...], preferred_element_type=jnp.float32) + ob_ref[...]
    o_ref[...] = logits.reshape(T, Bp, Vp).astype(o_ref.dtype)


def rnn_decode_fused(emb_tbe, h0, wx, wh, b, out_w, out_b):
    """emb_tbe:(T,Bp,E), h0:(Bp,Hp) -> logits (T,Bp,Vp). All operands pre-padded."""
    T, Bp, E = emb_tbe.shape
    Hp = wh.shape[0]
    Vp = out_w.shape[1]
    return pl.pallas_call(
        _decoder_kernel,
        out_shape=jax.ShapeDtypeStruct((T, Bp, Vp), jnp.float32),
        grid=(1,),
        in_specs=[
            pl.BlockSpec((T, Bp, E), lambda i: (0, 0, 0)),
            pl.BlockSpec((Bp, Hp), lambda i: (0, 0)),
            pl.BlockSpec((E, Hp), lambda i: (0, 0)),
            pl.BlockSpec((Hp, Hp), lambda i: (0, 0)),
            pl.BlockSpec((1, Hp), lambda i: (0, 0)),
            pl.BlockSpec((Hp, Vp), lambda i: (0, 0)),
            pl.BlockSpec((1, Vp), lambda i: (0, 0)),
        ],
        out_specs=pl.BlockSpec((T, Bp, Vp), lambda i: (0, 0, 0)),
        scratch_shapes=[pltpu.VMEM((T, Bp, Hp), jnp.float32)],
        compiler_params=pltpu.CompilerParams(dimension_semantics=("arbitrary",)),
    )(emb_tbe.astype(jnp.float32), h0.astype(jnp.float32), wx.astype(jnp.float32),
      wh.astype(jnp.float32), b.astype(jnp.float32),
      out_w.astype(jnp.float32), out_b.astype(jnp.float32))


def decoder(params, encoder_outputs, captions):
    """encoder_outputs: (B, Hdim); captions: (B, T) int32 -> logits (B, T, vocab)."""
    B, T = captions.shape
    Hdim = encoder_outputs.shape[1]
    V, E = params["embed"].shape

    # Pad to sublane/lane friendly shapes (zero padding is mathematically inert here).
    Bp = _round_up(B, 8)
    Hp = _round_up(Hdim, 128)
    Vp = _round_up(V, 128)

    emb = jnp.take(params["embed"], captions, axis=0)            # gather stays in JAX glue
    emb_tbe = jnp.transpose(emb, (1, 0, 2))                      # time-major (T, B, E)
    emb_tbe = jnp.pad(emb_tbe, ((0, 0), (0, Bp - B), (0, 0)))

    h0 = jnp.pad(encoder_outputs, ((0, Bp - B), (0, Hp - Hdim)))
    wx = jnp.pad(params["rnn_wx"], ((0, 0), (0, Hp - Hdim)))
    wh = jnp.pad(params["rnn_wh"], ((0, Hp - Hdim), (0, Hp - Hdim)))
    b_rnn = jnp.pad(params["rnn_b"], (0, Hp - Hdim)).reshape(1, Hp)
    out_w = jnp.pad(params["out_w"], ((0, Hp - Hdim), (0, Vp - V)))
    out_b = jnp.pad(params["out_b"], (0, Vp - V)).reshape(1, Vp)

    logits_pad = rnn_decode_fused(emb_tbe, h0, wx, wh, b_rnn, out_w, out_b)  # (T, Bp, Vp)
    logits = logits_pad[:, :B, :V]                               # strip padding
    return jnp.transpose(logits, (1, 0, 2))                      # (B, T, V)


# ----------------------------- Model params & forward -----------------------------

def init_params(key, cin=4, hdim=32, vocab=64):
    ks = jax.random.split(key, 8)
    s = 0.1
    return {
        "conv_w": s * jax.random.normal(ks[0], (hdim, cin, 3, 3), jnp.float32),
        "conv_b": s * jax.random.normal(ks[1], (hdim,), jnp.float32),
        "fc_w": s * jax.random.normal(ks[2], (hdim, hdim), jnp.float32),
        "fc_b": s * jax.random.normal(ks[3], (hdim,), jnp.float32),
        "embed": s * jax.random.normal(ks[4], (vocab, hdim), jnp.float32),
        "rnn_wx": s * jax.random.normal(ks[5], (hdim, hdim), jnp.float32),
        "rnn_wh": s * jax.random.normal(ks[6], (hdim, hdim), jnp.float32),
        "rnn_b": jnp.zeros((hdim,), jnp.float32),
        "out_w": s * jax.random.normal(ks[7], (hdim, vocab), jnp.float32),
        "out_b": jnp.zeros((vocab,), jnp.float32),
    }


def encoder_decoder_forward(params, images, captions):
    encoder_outputs = encoder(params, images)
    outputs = decoder(params, encoder_outputs, captions)
    return outputs


# ----------------------------- main -----------------------------

if __name__ == "__main__":
    key = jax.random.PRNGKey(0)
    k_img, k_cap, k_par = jax.random.split(key, 3)

    B, Cin, H, W = 2, 4, 16, 16
    T, Hdim, vocab = 8, 32, 64

    images = jax.random.normal(k_img, (B, Cin, H, W), jnp.float32)   # NCHW like PyTorch
    captions = jax.random.randint(k_cap, (B, T), 0, vocab, jnp.int32)

    params = init_params(k_par, cin=Cin, hdim=Hdim, vocab=vocab)

    out = encoder_decoder_forward(params, images, captions)
    jax.block_until_ready(out)
    assert out.shape == (B, T, vocab) and out.dtype == jnp.float32
    print("KERNEL_OK")
</pallas_src>

<mosaic_0001>
module attributes {stable_mosaic.version = 11 : i64} {
  func.func @_encoder_kernel(%arg0: i32, %arg1: i32, %arg2: memref<1x256x36xbf16, #tpu.memory_space<vmem>>, %arg3: memref<36x32xbf16, #tpu.memory_space<vmem>>, %arg4: memref<1x32xf32, #tpu.memory_space<vmem>>, %arg5: memref<32x32xf32, #tpu.memory_space<vmem>>, %arg6: memref<1x32xf32, #tpu.memory_space<vmem>>, %arg7: memref<1x1x32xf32, #tpu.memory_space<vmem>>, %arg8: memref<1x32xf32, #tpu.memory_space<vmem>>) attributes {dimension_semantics = [#tpu.dimension_semantics<parallel>, #tpu.dimension_semantics<arbitrary>], iteration_bounds = array<i64: 2, 1>, scalar_prefetch = 0 : i64, scratch_operands = 1 : i64, tpu.core_type = #tpu.core_type<tc>, window_params = [{transform_indices = @transform_0, window_bounds = array<i64: 1, 256, 36>}, {pipeline_mode = #tpu.pipeline_mode<synchronous>, transform_indices = @transform_1, window_bounds = array<i64: 36, 32>}, {pipeline_mode = #tpu.pipeline_mode<synchronous>, transform_indices = @transform_2, window_bounds = array<i64: 1, 32>}, {pipeline_mode = #tpu.pipeline_mode<synchronous>, transform_indices = @transform_3, window_bounds = array<i64: 32, 32>}, {pipeline_mode = #tpu.pipeline_mode<synchronous>, transform_indices = @transform_4, window_bounds = array<i64: 1, 32>}, {transform_indices = @transform_5, window_bounds = array<i64: 1, 1, 32>}]} {
    %c0_i32 = arith.constant 0 : i32
    %0 = arith.cmpi eq, %arg1, %c0_i32 : i32
    %1 = arith.extui %0 : i1 to i32
    %c0_i32_0 = arith.constant 0 : i32
    %2 = arith.cmpi ne, %1, %c0_i32_0 : i32
    scf.if %2 {
      %cst_15 = arith.constant 0.000000e+00 : f32
      %20 = vector.broadcast %cst_15 : f32 to vector<1x32xf32>
      %c0_16 = arith.constant 0 : index
      %c0_17 = arith.constant 0 : index
      %21 = vector.load %arg8[%c0_16, %c0_17] : memref<1x32xf32, #tpu.memory_space<vmem>>, vector<1x32xf32>
      tpu.vector_store %arg8[%c0_16, %c0_17], %20 {strides = array<i32>} : memref<1x32xf32, #tpu.memory_space<vmem>>, vector<1x32xf32>,
    } else {
    }
    %c0 = arith.constant 0 : index
    %c0_1 = arith.constant 0 : index
    %c0_2 = arith.constant 0 : index
    %3 = vector.load %arg2[%c0, %c0_1, %c0_2] : memref<1x256x36xbf16, #tpu.memory_space<vmem>>, vector<1x256x36xbf16>
    %4 = vector.shape_cast %3 : vector<1x256x36xbf16> to vector<256x36xbf16>
    %c0_3 = arith.constant 0 : index
    %c0_4 = arith.constant 0 : index
    %5 = vector.load %arg3[%c0_3, %c0_4] : memref<36x32xbf16, #tpu.memory_space<vmem>>, vector<36x32xbf16>
    %cst = arith.constant dense<0.000000e+00> : vector<256x32xf32>
    %6 = tpu.matmul %4, %5, %cst {dimension_numbers = #tpu.dot_dimension_numbers<[1], [0], [0], [1], [0, 0, 1, 1], [], []>} : vector<256x36xbf16>, vector<36x32xbf16>, vector<256x32xf32> -> vector<256x32xf32>
    %c0_5 = arith.constant 0 : index
    %c0_6 = arith.constant 0 : index
    %7 = vector.load %arg4[%c0_5, %c0_6] : memref<1x32xf32, #tpu.memory_space<vmem>>, vector<1x32xf32>
    %8 = vector.broadcast %7 : vector<1x32xf32> to vector<256x32xf32>
    %9 = arith.addf %6, %8 : vector<256x32xf32>
    %cst_7 = arith.constant 0.000000e+00 : f32
    %10 = vector.broadcast %cst_7 : f32 to vector<256x32xf32>
    %11 = arith.maximumf %9, %10 : vector<256x32xf32>
    %c0_8 = arith.constant 0 : index
    %c0_9 = arith.constant 0 : index
    %12 = vector.load %arg8[%c0_8, %c0_9] : memref<1x32xf32, #tpu.memory_space<vmem>>, vector<1x32xf32>
    %cst_10 = arith.constant dense<0.000000e+00> : vector<32xf32>
    %13 = vector.multi_reduction <add>, %11, %cst_10 [0] : vector<256x32xf32> to vector<32xf32>
    %14 = vector.shape_cast %13 : vector<32xf32> to vector<1x32xf32>
    %15 = arith.addf %12, %14 : vector<1x32xf32>
    %c0_11 = arith.constant 0 : index
    %c0_12 = arith.constant 0 : index
    %16 = vector.load %arg8[%c0_11, %c0_12] : memref<1x32xf32, #tpu.memory_space<vmem>>, vector<1x32xf32>
    tpu.vector_store %arg8[%c0_11, %c0_12], %15 {strides = array<i32>} : memref<1x32xf32, #tpu.memory_space<vmem>>, vector<1x32xf32>,
    %c0_i32_13 = arith.constant 0 : i32
    %17 = arith.cmpi eq, %arg1, %c0_i32_13 : i32
    %18 = arith.extui %17 : i1 to i32
    %c0_i32_14 = arith.constant 0 : i32
    %19 = arith.cmpi ne, %18, %c0_i32_14 : i32
    scf.if %19 {
      %c0_15 = arith.constant 0 : index
      %c0_16 = arith.constant 0 : index
      %20 = vector.load %arg8[%c0_15, %c0_16] : memref<1x32xf32, #tpu.memory_space<vmem>>, vector<1x32xf32>
      %cst_17 = arith.constant 3.906250e-03 : f32
      %21 = vector.broadcast %cst_17 : f32 to vector<1x32xf32>
      %22 = arith.mulf %20, %21 : vector<1x32xf32>
      %c0_18 = arith.constant 0 : index
      %c0_19 = arith.constant 0 : index
      %23 = vector.load %arg5[%c0_18, %c0_19] : memref<32x32xf32, #tpu.memory_space<vmem>>, vector<32x32xf32>
      %cst_20 = arith.constant dense<0.000000e+00> : vector<1x32xf32>
      %24 = tpu.matmul %22, %23, %cst_20 {dimension_numbers = #tpu.dot_dimension_numbers<[1], [0], [0], [1], [0, 0, 1, 1], [], []>} : vector<1x32xf32>, vector<32x32xf32>, vector<1x32xf32> -> vector<1x32xf32>
      %c0_21 = arith.constant 0 : index
      %c0_22 = arith.constant 0 : index
      %25 = vector.load %arg6[%c0_21, %c0_22] : memref<1x32xf32, #tpu.memory_space<vmem>>, vector<1x32xf32>
      %26 = arith.addf %24, %25 : vector<1x32xf32>
      %c0_23 = arith.constant 0 : index
      %c0_24 = arith.constant 0 : index
      %c0_25 = arith.constant 0 : index
      %27 = vector.load %arg7[%c0_23, %c0_24, %c0_25] : memref<1x1x32xf32, #tpu.memory_space<vmem>>, vector<1x1x32xf32>
      %28 = vector.shape_cast %27 : vector<1x1x32xf32> to vector<1x32xf32>
      %29 = vector.shape_cast %26 : vector<1x32xf32> to vector<1x1x32xf32>
      tpu.vector_store %arg7[%c0_23, %c0_24, %c0_25], %29 {strides = array<i32>} : memref<1x1x32xf32, #tpu.memory_space<vmem>>, vector<1x1x32xf32>,
    } else {
    }
    return
  }
  func.func @transform_0(%arg0: i32, %arg1: i32) -> (i32, i32, i32) {
    %c0_i32 = arith.constant 0 : i32
    %c0_i32_0 = arith.constant 0 : i32
    return %arg0, %arg1, %c0_i32 : i32, i32, i32
  }
  func.func @transform_1(%arg0: i32, %arg1: i32) -> (i32, i32) {
    %c0_i32 = arith.constant 0 : i32
    %c0_i32_0 = arith.constant 0 : i32
    %c0_i32_1 = arith.constant 0 : i32
    return %c0_i32, %c0_i32_0 : i32, i32
  }
  func.func @transform_2(%arg0: i32, %arg1: i32) -> (i32, i32) {
    %c0_i32 = arith.constant 0 : i32
    %c0_i32_0 = arith.constant 0 : i32
    %c0_i32_1 = arith.constant 0 : i32
    return %c0_i32, %c0_i32_0 : i32, i32
  }
  func.func @transform_3(%arg0: i32, %arg1: i32) -> (i32, i32) {
    %c0_i32 = arith.constant 0 : i32
    %c0_i32_0 = arith.constant 0 : i32
    %c0_i32_1 = arith.constant 0 : i32
    return %c0_i32, %c0_i32_0 : i32, i32
  }
  func.func @transform_4(%arg0: i32, %arg1: i32) -> (i32, i32) {
    %c0_i32 = arith.constant 0 : i32
    %c0_i32_0 = arith.constant 0 : i32
    %c0_i32_1 = arith.constant 0 : i32
    return %c0_i32, %c0_i32_0 : i32, i32
  }
  func.func @transform_5(%arg0: i32, %arg1: i32) -> (i32, i32, i32) {
    %c0_i32 = arith.constant 0 : i32
    %c0_i32_0 = arith.constant 0 : i32
    %c0_i32_1 = arith.constant 0 : i32
    return %arg0, %c0_i32, %c0_i32_0 : i32, i32, i32
  }
}

</mosaic_0001>

<bundles_post_ra>
// kernel: tpu_custom_call.1
= control target key start
LH: loop header
LB: loop body
LE: loop exit
PB: predicated region body
PF: predicated region fallthrough
CT: control target
= control target key end

     0   :  { %10 = vsyncpa [#allocation4], 0  ;;  %s1315_s0 = inlined_call_operand.vmem [shape: bf16[2,256,36], index: 0, kind: input, shape index: {}]   ;;  %s1316_s1 = inlined_call_operand.vmem [shape: bf16[36,32], index: 1, kind: input, shape index: {}]   ;;  %s1317_s2 = inlined_call_operand.vmem [shape: f32[1,32], index: 2, kind: input, shape index: {}]   ;;  %s1318_s3 = inlined_call_operand.vmem [shape: f32[32,32], index: 3, kind: input, shape index: {}]   ;;  %s1319_s4 = inlined_call_operand.vmem [shape: f32[1,32], index: 4, kind: input, shape index: {}]   ;;  %s1320_s5 = inlined_call_operand.hbm [shape: f32[2,1,32], index: 5, kind: output, shape index: {}]  }
   0x1   :  { %12 = vsyncpa [#allocation4 + $0x1], 0  ;;  %s1051_s18 = smov 0   ;;  %s1053_s19 = smov 0  }
   0x2   :  { %s1055_s20 = smov 0   ;;  %s1057_s21 = smov 0  }
   0x3   :  { %s1059_s22 = smov 0   ;;  %s1061_s23 = smov 0  }
   0x4 LB: > { %s757_s24 = sadd.s32 4294967295, %s1018_s23   ;;  %s758_s25 = sadd.s32 4294967294, %s1018_s23   ;;  %s1018_s23 = sphi %s1061_s23, %s18_s23   ;;  %s1014_s22 = sphi %s1059_s22, %s1327_s22   ;;  %s1010_s21 = sphi %s1057_s21, %s1326_s21   ;;  %s1006_s20 = sphi %s1055_s20, %s1325_s20   ;;  %s1002_s19 = sphi %s1053_s19, %s1324_s19   ;;  %s998_s18 = sphi %s1051_s18, %s1323_s18  }
   0x5   : > { %s30_s26 = sadd.s32 1, %s1014_s22  ;;  %s149_s27 = sadd.s32 1, %s1006_s20 }
   0x6   : > { %p32_p0 = scmp.ge.s32.totalorder %s30_s26, 2  ;;  %p159_p1 = scmp.ne.s32.totalorder %s1006_s20, %s1002_s19 }
   0x7   : > { %p160_p2 = scmp.eq.s32.totalorder %s757_s24, 1  ;;  %p165_p3 = scmp.ne.s32.totalorder %s1002_s19, %s998_s18 }
   0x8   : > { %s1329_s26 = smov (%p32_p0, %s30_s26), 0  ;;  %p166_p5 = scmp.eq.s32.totalorder %s758_s25, 1 }
   0x9   : > { %p1091_p4 = por %p160_p2, %p159_p1  ;;  %s146_s29 = ssub.s32 %s1014_s22, %s1329_s26 }
   0xa   : > { %p761_p6 = scmp.ge.s32.totalorder %s1018_s23, 1  ;;  %p147_p7 = scmp.eq.s32.totalorder %s146_s29, 0 }
   0xb   : > { %p1098_p8 = por %p166_p5, %p165_p3  ;;  %p209_p9 = scmp.lt.s32.totalorder %s1018_s23, 3 }
   0xc   : > { %s1104_s6 = scalar_select %p147_p7, %s1006_s20, %s149_s27  }
   0xd   : > { %p210_p10 = pnand %p761_p6, %p209_p9 }
   0xe   : > { %p241_p11 = scmp.lt.s32.totalorder (!%p210_p10), %s1010_s21, 1  ;;  %s238_s13 = sand.u32 (!%p210_p10), 1, %s1002_s19  }
   0xf   : > { %213 = sbr.rel (%p210_p10) target bundleno = 429 (0x1ad), region = 40  ;;  %s684_s16 = scalar_lea.hbm (!%p210_p10), %s1320_s5, %s1010_s21 }
  0x10   : > { %s239_s25 = scalar_lea.vmem (!%p210_p10), [#allocation3], %s238_s13  ;;  %s688_s29 = sshll.u32 (!%p210_p10), %s684_s16, 4  ;;  %s689_s29 = int_to_ptr.hbm [resolvable:$true] %s688_s29 }
  0x11   : > { %s686_s27 = sshll.u32 (!%p210_p10), %s239_s25, 4  ;;  %s676_s7 = scalar_lea.sflag (!%p210_p10), [#allocation4], %s238_s13  ;;  %s687_s27 = int_to_ptr.vmem [resolvable:$true] %s686_s27 }
  0x12   : > { %s954_s8 = sshra.s32 (!%p210_p10), %s689_s29, 4  ;;  %s960_s11 = scalar_lea.hbm (!%p210_p10), %s1320_s5, 2  ;;  %s955_s8 = int_to_ptr.hbm [resolvable:$true] %s954_s8 }
  0x13   : > { %p961_p1 = scmp.lt.s32.totalorder (!%p210_p10), %s955_s8, %s1320_s5 }
  0x14   : > { %v293_v0 = vld [vmem:[%s1316_s1 + $0x10] sm:$0x3]  ;;  %vm442_vm0 = vcmask 1041408   ;;  %s242_s9 = scalar_select %p241_p11, %s1010_s21, 1  ;;  %v873_v4 = vld [vmem:[%s1316_s1 + $0x8] sm:$0xff]  ;;  %v872_v5 = vld [vmem:[%s1316_s1] sm:$0xff] }
  0x15   : > { %v387_v1 = vunpack.c.l.b16 %v293_v0  ;;  %vm393_vm1 = vcmask 293888   ;;  %v1171_v35 = vld [vmem:[%s1317_s2] ss:$0 sm:$0xff]  ;;  %vm568_vm2 = vcmask 261120   ;;  %vm255_vm3 = vcmask 253952  }
  0x16   : > { %s855_s12 = sshll.u32 %s242_s9, 7  ;;  %s956_s9 = scalar_lea.hbm %s955_s8, 1 }
  0x17   : > { %v390_v2 = vpack.c.b16 %v387_v1, %v387_v1  ;;  %s1120_s17 = scalar_lea.vmem %s1315_s0, %s855_s12  ;;  %p957_p12 = scmp.ne.s32.totalorder %s955_s8, %s956_s9 }
  0x18   : > { %v856_v6 = vld [vmem:[%s1120_s17] sm:$0xff]  ;;  %v862_v7 = vld [vmem:[%s1120_s17 + $0x30] sm:$0xff]  ;;  %v867_v8 = vld [vmem:[%s1120_s17 + $0x58] sm:$0xff]  ;;  %p962_p2 = scmp.lt.s32.totalorder %s960_s11, %s956_s9 }
  0x19   : > { %v444_v3 = vsel %vm442_vm0, %v390_v2, 0  ;;  %v860_v9 = vld [vmem:[%s1120_s17 + $0x20] sm:$0xff]  ;;  %v857_v10 = vld [vmem:[%s1120_s17 + $0x8] sm:$0xff]  ;;  %v863_v11 = vld [vmem:[%s1120_s17 + $0x38] sm:$0xff]  ;;  %p958_p13 = pnand %p957_p12, %p1091_p4 }
  0x1a   : > { %451 = vmatpush.bf16.msra.mxu0 %v444_v3  ;;  %875 = vmatpush.bf16.msra.mxu2 %v444_v3  ;;  %v868_v12 = vld [vmem:[%s1120_s17 + $0x60] sm:$0xff]  ;;  %v861_v13 = vld [vmem:[%s1120_s17 + $0x28] sm:$0xff]  ;;  %v858_v14 = vld [vmem:[%s1120_s17 + $0x10] sm:$0xff]  ;;  %p963_p3 = por %p962_p2, %p961_p1 }
  0x1b   : > { %876 = vmatpush.bf16.msra.mxu3 %v444_v3  ;;  %874 = vmatpush.bf16.msra.mxu1 %v444_v3  ;;  %v864_v15 = vld [vmem:[%s1120_s17 + $0x40] sm:$0xff]  ;;  %v869_v16 = vld [vmem:[%s1120_s17 + $0x68] sm:$0xff]  ;;  %v859_v17 = vld [vmem:[%s1120_s17 + $0x18] sm:$0xff]  ;;  %p959_p0 = pneg %p958_p13 }
  0x1c   : > { %v865_v18 = vld [vmem:[%s1120_s17 + $0x48] sm:$0xff]  ;;  %v870_v19 = vld [vmem:[%s1120_s17 + $0x70] sm:$0xff]  ;;  %v871_v21 = vld [vmem:[%s1120_s17 + $0x78] sm:$0xff] }
  0x1d   : > { %v866_v20 = vld [vmem:[%s1120_s17 + $0x50] sm:$0xff]  ;;  %p964_p5 = pnand %p963_p3, %p959_p0 }
  0x1e   : > { %452 = vmatpush.bf16.msra.mxu0 %v873_v4  ;;  %878 = vmatpush.bf16.msra.mxu2 %v873_v4 }
  0x1f   : > { %879 = vmatpush.bf16.msra.mxu3 %v873_v4  ;;  %877 = vmatpush.bf16.msra.mxu1 %v873_v4 }
  0x22   : > { %453 = vmatpush.bf16.msra.mxu0 %v872_v5  ;;  %881 = vmatpush.bf16.msra.mxu2 %v872_v5 }
  0x23   : > { %882 = vmatpush.bf16.msra.mxu3 %v872_v5  ;;  %880 = vmatpush.bf16.msra.mxu1 %v872_v5 }
  0x25   : > { %836 = vmatmul.msk.bf16.vlgmr.msra.gmra.mxu0 %vm393_vm1, %v856_v6  ;;  %842 = vmatmul.msk.bf16.vlgmr.msra.gmra.mxu2 %vm393_vm1, %v862_v7 }
  0x26   : > { %847 = vmatmul.msk.bf16.vlgmr.msra.gmra.mxu3 %vm393_vm1, %v867_v8  ;;  %840 = vmatmul.msk.bf16.vlgmr.msra.gmra.mxu1 %vm393_vm1, %v860_v9 }
  0x35   : > { %837 = vmatmul.msk.bf16.gmra.mxu0 %vm393_vm1, %v857_v10  ;;  %843 = vmatmul.msk.bf16.gmra.mxu2 %vm393_vm1, %v863_v11 }
  0x36   : > { %848 = vmatmul.msk.bf16.gmra.mxu3 %vm393_vm1, %v868_v12  ;;  %841 = vmatmul.msk.bf16.gmra.mxu1 %vm393_vm1, %v861_v13 }
  0x45   : > { %838 = vmatmul.msk.bf16.gmra.mxu0 %vm393_vm1, %v858_v14  ;;  %844 = vmatmul.msk.bf16.gmra.mxu2 %vm393_vm1, %v864_v15 }
  0x46   : > { %849 = vmatmul.msk.bf16.gmra.mxu3 %vm393_vm1, %v869_v16 }
  0x55   : > { %839 = vmatmul.msk.bf16.gmra.mxu0 %vm393_vm1, %v859_v17  ;;  %845 = vmatmul.msk.bf16.gmra.mxu2 %vm393_vm1, %v865_v18 }
  0x56   : > { %850 = vmatmul.msk.bf16.gmra.mxu3 %vm393_vm1, %v870_v19 }
  0x65   : > { %846 = vmatmul.msk.bf16.gmra.mxu2 %vm393_vm1, %v866_v20 }
  0x66   : > { %851 = vmatmul.msk.bf16.gmra.mxu3 %vm393_vm1, %v871_v21 }
  0xa2   : > { %v455_v22 = vpop.f32.mrf.mxu0 }
  0xa3   : > { %v475_v31 = vpop.f32.mrf.mxu1  ;;  %v456_v41 = vadd.f32 %v1171_v35, %v455_v22 }
  0xa4   : > { %v476_v3 = vadd.f32 %v1171_v35, %v475_v31 }
  0xa5   : > { %v535_v45 = vmax.f32 %v456_v41, 0.0 }
  0xa6   : > { %v543_v13 = vmax.f32 %v476_v3, 0.0 }
  0xa7   : > { %v569_v55 = vsel %vm568_vm2, %v535_v45, 0.0 }
  0xa8   : > { %v1154_v23 = vpop.f32.mrf.mxu2 }
  0xa9   : > { %v1156_v25 = vpop.f32.mrf.mxu3  ;;  %v486_v22 = vadd.f32 %v1171_v35, %v1154_v23 }
  0xaa   : > { %v457_v24 = vpop.f32.mrf.mxu0 }
  0xab   : > { %v477_v36 = vpop.f32.mrf.mxu1  ;;  %v458_v39 = vadd.f32 %v1171_v35, %v457_v24  ;;  %v584_v24 = vsel %vm568_vm2, %v543_v13, 0.0 }
  0xac   : > { %v478_v7 = vadd.f32 %v1171_v35, %v477_v36 }
  0xad   : > { %v536_v43 = vmax.f32 %v458_v39, 0.0 }
  0xae   : > { %v544_v17 = vmax.f32 %v478_v7, 0.0 }
  0xaf   : > { %v570_v49 = vsel %vm568_vm2, %v536_v43, 0.0 }
  0xb0   : > { %v1158_v26 = vpop.f32.mrf.mxu2  ;;  %v571_v59 = vadd.f32 %v570_v49, %v569_v55 }
  0xb1   : > { %v1160_v28 = vpop.f32.mrf.mxu3  ;;  %v488_v31 = vadd.f32 %v1171_v35, %v1158_v26 }
  0xb2   : > { %v460_v27 = vpop.f32.mrf.mxu0 }
  0xb3   : > { %v461_v42 = vadd.f32 %v1171_v35, %v460_v27  ;;  %v480_v52 = vpop.f32.mrf.mxu1  ;;  %v548_v23 = vmax.f32 %v488_v31, 0.0 }
  0xb4   : > { %v481_v14 = vadd.f32 %v1171_v35, %v480_v52 }
  0xb5   : > { %v537_v46 = vmax.f32 %v461_v42, 0.0  ;;  %v594_v52 = vsel %vm568_vm2, %v548_v23, 0.0 }
  0xb6   : > { %v545_v27 = vmax.f32 %v481_v14, 0.0  ;;  %v513_v14 = vadd.f32 %v1171_v35, %v1160_v28 }
  0xb7   : > { %v572_v56 = vsel %vm568_vm2, %v537_v46, 0.0 }
  0xb8   : > { %v1162_v29 = vpop.f32.mrf.mxu2  ;;  %v573_v62 = vadd.f32 %v572_v56, %v571_v59  ;;  %v588_v42 = vsel %vm568_vm2, %v545_v27, 0.0 }
  0xb9   : > { %v1164_v32 = vpop.f32.mrf.mxu3  ;;  %v491_v41 = vadd.f32 %v1171_v35, %v1162_v29 }
  0xba   : > { %v462_v30 = vpop.f32.mrf.mxu0 }
  0xbb   : > { %v463_v44 = vadd.f32 %v1171_v35, %v462_v30  ;;  %v482_v11 = vpop.f32.mrf.mxu1 }
  0xbc   : > { %v483_v19 = vadd.f32 %v1171_v35, %v482_v11 }
  0xbd   : > { %v538_v50 = vmax.f32 %v463_v44, 0.0 }
  0xbe   : > { %v546_v36 = vmax.f32 %v483_v19, 0.0  ;;  %v516_v19 = vadd.f32 %v1171_v35, %v1164_v32 }
  0xbf   : > { %v574_v60 = vsel %vm568_vm2, %v538_v50, 0.0  ;;  %v549_v50 = vmax.f32 %v491_v41, 0.0 }
  0xc0   : > { %v1166_v33 = vpop.f32.mrf.mxu2  ;;  %v575_v1 = vadd.f32 %v574_v60, %v573_v62  ;;  %v590_v46 = vsel %vm568_vm2, %v546_v36, 0.0  ;;  %v559_v31 = vmax.f32 %v516_v19, 0.0 }
  0xc1   : > { %v1175_v38 = vpop.f32.mrf.mxu3  ;;  %v493_v45 = vadd.f32 %v1171_v35, %v1166_v33 }
  0xc2   : > { %v465_v34 = vpop.f32.mrf.mxu0 }
  0xc3   : > { %v466_v47 = vadd.f32 %v1171_v35, %v465_v34  ;;  %v586_v34 = vsel %vm568_vm2, %v544_v17, 0.0 }
  0xc5   : > { %v539_v57 = vmax.f32 %v466_v47, 0.0 }
  0xc7   : > { %v576_v63 = vsel %vm568_vm2, %v539_v57, 0.0  ;;  %v596_v57 = vsel %vm568_vm2, %v549_v50, 0.0 }
  0xc8   : > { %v1173_v37 = vpop.f32.mrf.mxu2  ;;  %v577_v5 = vadd.f32 %v576_v63, %v575_v1 }
  0xc9   : > { %v1184_v54 = vpop.f32.mrf.mxu3 }
  0xca   : > { %v467_v40 = vpop.f32.mrf.mxu0 }
  0xcb   : > { %v468_v51 = vadd.f32 %v1171_v35, %v467_v40  ;;  %v547_v40 = vmax.f32 %v486_v22, 0.0 }
  0xcd   : > { %v540_v61 = vmax.f32 %v468_v51, 0.0  ;;  %v592_v49 = vsel %vm568_vm2, %v547_v40, 0.0  ;;  %v496_v51 = vadd.f32 %v1171_v35, %v1173_v37  ;;  %v1020_v37 = vmov 0.0  }
  0xce   : > { %256 = vst.msk [vmem:[#allocation2] sm:$0x1] %vm255_vm3, %v1020_v37 }
  0xcf   : > { %v578_v4 = vsel %vm568_vm2, %v540_v61, 0.0  ;;  %v551_v33 = vmax.f32 %v496_v51, 0.0  ;;  %v646_v51 = vld [vmem:[%s1318_s3] sm:$0xff] }
  0xd0   : > { %v497_v48 = vpop.f32.mrf.mxu2  ;;  %v579_v10 = vadd.f32 %v578_v4, %v577_v5 }
  0xd1   : > { %v1196_v12 = vpop.f32.mrf.mxu3  ;;  %v498_v55 = vadd.f32 %v1171_v35, %v497_v48  ;;  %v600_v48 = vsel %vm568_vm2, %v551_v33, 0.0 }
  0xd2   : > { %v470_v53 = vpop.f32.mrf.mxu0  ;;  %v523_v40 = vadd.f32 %v1171_v35, %v1196_v12  ;;  %v647_v12 = vld [vmem:[%s1318_s3 + $0x8] sm:$0xff] }
  0xd3   : > { %v471_v58 = vadd.f32 %v1171_v35, %v470_v53  ;;  %v550_v53 = vmax.f32 %v493_v45, 0.0  ;;  %v552_v61 = vmax.f32 %v498_v55, 0.0 }
  0xd5   : > { %v541_v0 = vmax.f32 %v471_v58, 0.0  ;;  %v598_v60 = vsel %vm568_vm2, %v550_v53, 0.0 }
  0xd7   : > { %v580_v8 = vsel %vm568_vm2, %v541_v0, 0.0 }
  0xd8   : > { %v500_v2 = vpop.f32.mrf.mxu2  ;;  %v581_v16 = vadd.f32 %v580_v8, %v579_v10 }
  0xd9   : > { %v1210_v44 = vpop.f32.mrf.mxu3  ;;  %v501_v58 = vadd.f32 %v1171_v35, %v500_v2  ;;  %v602_v2 = vsel %vm568_vm2, %v552_v61, 0.0 }
  0xda   : > { %v472_v6 = vpop.f32.mrf.mxu0 }
  0xdb   : > { %v473_v9 = vadd.f32 %v1171_v35, %v472_v6  ;;  %v553_v3 = vmax.f32 %v501_v58, 0.0 }
  0xdd   : > { %v542_v15 = vmax.f32 %v473_v9, 0.0  ;;  %v511_v9 = vadd.f32 %v1171_v35, %v1156_v25  ;;  %v604_v10 = vsel %vm568_vm2, %v553_v3, 0.0  ;;  %v558_v25 = vmax.f32 %v513_v14, 0.0 }
  0xdf   : > { %v582_v18 = vsel %vm568_vm2, %v542_v15, 0.0  ;;  %v614_v32 = vsel %vm568_vm2, %v558_v25, 0.0 }
  0xe0   : > { %v583_v20 = vadd.f32 %v582_v18, %v581_v16  ;;  %v502_v21 = vpop.f32.mrf.mxu2  ;;  %v557_v18 = vmax.f32 %v511_v9, 0.0 }
  0xe1   : > { %v503_v62 = vadd.f32 %v1171_v35, %v502_v21  ;;  %v527_v1 = vpop.f32.mrf.mxu3 }
  0xe2   : > { %v585_v30 = vadd.f32 %v584_v24, %v583_v20  ;;  %v518_v24 = vadd.f32 %v1171_v35, %v1175_v38  ;;  %v612_v28 = vsel %vm568_vm2, %v557_v18, 0.0  ;;  %v649_v38 = vld [vmem:[%s1318_s3 + $0x18] sm:$0xff] }
  0xe3   : > { %v554_v6 = vmax.f32 %v503_v62, 0.0  ;;  %666 = vmatpush.msrb.mxu1 %v649_v38 }
  0xe4   : > { %v587_v39 = vadd.f32 %v586_v34, %v585_v30  ;;  %v521_v34 = vadd.f32 %v1171_v35, %v1184_v54  ;;  %v526_v54 = vadd.f32 %v1171_v35, %v1210_v44 }
  0xe5   : > { %v606_v15 = vsel %vm568_vm2, %v554_v6, 0.0  ;;  %v567_v6 = vld [vmem:[#allocation2] sm:$0x1] }
  0xe6   : > { %v589_v43 = vadd.f32 %v588_v42, %v587_v39  ;;  %v560_v39 = vmax.f32 %v518_v24, 0.0  ;;  %v648_v42 = vld [vmem:[%s1318_s3 + $0x10] sm:$0xff]  ;;  %v561_v23 = vmax.f32 %v521_v34, 0.0 }
  0xe7   : > { %667 = vmatpush.msrb.mxu1 %v648_v42 }
  0xe8   : > { %v591_v26 = vadd.f32 %v590_v46, %v589_v43  ;;  %v505_v47 = vpop.f32.mrf.mxu2  ;;  %v616_v43 = vsel %vm568_vm2, %v559_v31, 0.0  ;;  %v618_v46 = vsel %vm568_vm2, %v560_v39, 0.0  ;;  %v620_v44 = vsel %vm568_vm2, %v561_v23, 0.0 }
  0xe9   : > { %v506_v4 = vadd.f32 %v1171_v35, %v505_v47  ;;  %v530_v22 = vpop.f32.mrf.mxu3  ;;  %v528_v47 = vadd.f32 %v1171_v35, %v527_v1  ;;  %668 = vmatpush.msrb.mxu1 %v647_v12 }
  0xea   : > { %v593_v29 = vadd.f32 %v592_v49, %v591_v26  ;;  %v562_v26 = vmax.f32 %v523_v40, 0.0 }
  0xeb   : > { %v555_v11 = vmax.f32 %v506_v4, 0.0  ;;  %669 = vmatpush.msrb.mxu1 %v646_v51 }
  0xec   : > { %v595_v56 = vadd.f32 %v594_v52, %v593_v29  ;;  %v563_v29 = vmax.f32 %v526_v54, 0.0  ;;  %v531_v52 = vadd.f32 %v1171_v35, %v530_v22  ;;  %v622_v55 = vsel %vm568_vm2, %v562_v26, 0.0 }
  0xed   : > { %v608_v20 = vsel %vm568_vm2, %v555_v11, 0.0  ;;  %v650_v11 = vld [vmem:[%s1319_s4] sm:$0x1] }
  0xee   : > { %v597_v59 = vadd.f32 %v596_v57, %v595_v56  ;;  %v564_v56 = vmax.f32 %v528_v47, 0.0  ;;  %v624_v58 = vsel %vm568_vm2, %v563_v29, 0.0 }
  0xf0   : > { %v599_v63 = vadd.f32 %v598_v60, %v597_v59  ;;  %v507_v0 = vpop.f32.mrf.mxu2  ;;  %v565_v59 = vmax.f32 %v531_v52, 0.0  ;;  %v626_v61 = vsel %vm568_vm2, %v564_v56, 0.0 }
  0xf1   : > { %v508_v7 = vadd.f32 %v1171_v35, %v507_v0  ;;  %v532_v50 = vpop.f32.mrf.mxu3 }
  0xf2   : > { %v601_v5 = vadd.f32 %v600_v48, %v599_v63  ;;  %v533_v57 = vadd.f32 %v1171_v35, %v532_v50  ;;  %v628_v63 = vsel %vm568_vm2, %v565_v59, 0.0 }
  0xf3   : > { %v556_v16 = vmax.f32 %v508_v7, 0.0 }
  0xf4   : > { %v603_v8 = vadd.f32 %v602_v2, %v601_v5  ;;  %v566_v62 = vmax.f32 %v533_v57, 0.0 }
  0xf5   : > { %v610_v27 = vsel %vm568_vm2, %v556_v16, 0.0 }
  0xf6   : > { %v605_v13 = vadd.f32 %v604_v10, %v603_v8  ;;  %v630_v1 = vsel %vm568_vm2, %v566_v62, 0.0 }
  0xf8   : > { %v607_v17 = vadd.f32 %v606_v15, %v605_v13 }
  0xfa   : > { %v609_v21 = vadd.f32 %v608_v20, %v607_v17 }
  0xfc   : > { %v611_v30 = vadd.f32 %v610_v27, %v609_v21 }
  0xfe   : > { %v613_v36 = vadd.f32 %v612_v28, %v611_v30 }
 0x100   : > { %v615_v41 = vadd.f32 %v614_v32, %v613_v36 }
 0x102   : > { %v617_v45 = vadd.f32 %v616_v43, %v615_v41 }
 0x104   : > { %v619_v49 = vadd.f32 %v618_v46, %v617_v45 }
 0x106   : > { %v621_v53 = vadd.f32 %v620_v44, %v619_v49 }
 0x108   : > { %v623_v33 = vadd.f32 %v622_v55, %v621_v53 }
 0x10a   : > { %v625_v60 = vadd.f32 %v624_v58, %v623_v33 }
 0x10c   : > { %v627_v37 = vadd.f32 %v626_v61, %v625_v60 }
 0x10e   : > { %v629_v0 = vadd.f32 %v628_v63, %v627_v37 }
 0x110   : > { %v631_v48 = vadd.f32 %v630_v1, %v629_v0 }
 0x112   : > { %v632_v3 = vrot.slane %v631_v48, 4 }
 0x114   : > { %v633_v35 = vadd.f32 %v632_v3, %v631_v48 }
 0x116   : > { %v634_v4 = vrot.slane %v633_v35, 2 }
 0x118   : > { %v635_v5 = vadd.f32 %v634_v4, %v633_v35 }
 0x11a   : > { %v636_v2 = vrot.slane %v635_v5, 1 }
 0x11c   : > { %v637_v7 = vadd.f32 %v636_v2, %v635_v5 }
 0x11e   : > { %v638_v8 = vadd.f32 %v637_v7, %v567_v6 }
 0x120   : > { %640 = vst.msk [vmem:[#allocation2] sm:$0x1] %vm255_vm3, %v638_v8 }
 0x127   : > { %v644_v9 = vld [vmem:[#allocation2] sm:$0x1] }
 0x128   : > { %v645_v10 = vmul.f32 0.00390625, %v644_v9 }
 0x12a   : > { %852 = vmatmul.msk.f32.vlgmr.msrb.gmra.mxu1 %vm568_vm2, %v645_v10 }
 0x1a7   : > { %v671_v13 = vpop.f32.mrf.mxu1 }
 0x1a8   : > { %v672_v14 = vadd.f32 %v671_v13, %v650_v11 }
 0x1aa   : > { %674 = vst.msk [vmem:[%s239_s25] sm:$0x1] %vm255_vm3, %v672_v14 }
 0x1ab   : > { %967 = shalt.err (!%p964_p5)
}
 0x1ac   : > { %883 = dma.vmem_to_hbm [thread:$0]  (%p1091_p4), %s687_s27, 16, %s689_s29, %s676_s7  }
 0x1ad PF: > { %p889_p6 = scmp.ge.s32.totalorder %s1018_s23, 2  ;;  %s700_s13 = sand.u32 1, %s998_s18  }
 0x1ae   : > { %s701_s15 = scalar_lea.sflag [#allocation4], %s700_s13 }
 0x1af   : > { %p886_p7 = pnand %p889_p6, %p1098_p8 }
 0x1b1   : > { %p887_p9 = pneg %p886_p7 }
 0x1b3   : > { %993 = dma.done.wait (%p887_p9), %s701_s15, 16  }
 0x1b4   : > { %995 = vsyncadd (%p887_p9), %s701_s15, 4294967280  ;;  %s18_s23 = sadd.s32 1, %s1018_s23   ;;  %s1323_s18 = smov %s1002_s19 }
 0x1b5   : > { %p15_p10 = scmp.ge.s32.totalorder %s18_s23, 4   ;;  %s1324_s19 = smov %s1006_s20 }
 0x1b6   : > { %s1325_s20 = smov %s1104_s6  ;;  %s1326_s21 = smov %s1014_s22 }
 0x1b7   : > { %s1327_s22 = smov %s1329_s26  ;;  %17 = sbr.rel (!%p15_p10) target bundleno = 4 (0x4), region = 83 }
 0x1bc   :  { %706 = vsyncpa [#allocation4], 1 }
 0x1bd   :  { %708 = vsyncpa [#allocation4 + $0x1], 1 }

</bundles_post_ra>
